<compile_context>
chip_gen: v7x
topology: tpu7x:2x2x1
jax: 0.10.0
libtpu: 0.0.40
codegen_flags: <defaults>
</compile_context>

<pallas_src>
import functools

import jax
import jax.numpy as jnp
import numpy as np
from jax.experimental import pallas as pl
from jax.experimental.pallas import tpu as pltpu

H = 32            # hidden_size
I = 64            # MLP intermediate size
E = 4             # number of MoE experts
NB = 1 + E        # shared block + expert blocks
NBI = NB * I      # 320  (fused feature width)
TM_MAX = 512      # max token tile (multiple of 8)


def _silu(x):
    return x * jax.nn.sigmoid(x)


def _round_up(n, m):
    return ((n + m - 1) // m) * m


def combined_kernel(x_ref, wgall_ref, wuall_ref, wrg_ref,
                    sshared_ref, sexp_ref, wd_ref,
                    out_ref, psum_ref, *, tm, t_real):
    x = x_ref[...]                                   # [tm, H], input dtype
    xc = x.astype(wgall_ref.dtype)                   # compute dtype for MXU

    # ---- fused gate / up projections (shared MLP + all experts) ----------
    g = jnp.dot(xc, wgall_ref[...], preferred_element_type=jnp.float32)   # [tm, NBI]
    u = jnp.dot(xc, wuall_ref[...], preferred_element_type=jnp.float32)   # [tm, NBI]
    h = _silu(g) * u                                                      # fp32

    # ---- router + 'ds' gate logits (gate defined on x.float() -> fp32) ---
    rg = jnp.dot(x.astype(jnp.float32), wrg_ref[...],
                 preferred_element_type=jnp.float32)                      # [tm, E+2]
    probs = jax.nn.softmax(rg[:, :E], axis=-1)                            # [tm, E]
    w = jax.nn.softmax(rg[:, E:], axis=-1)                                # [tm, 2]

    # ---- per-tile masked column sum of router probs (aux loss in JAX) ----
    row = pl.program_id(0) * tm + jax.lax.broadcasted_iota(jnp.int32, (tm, 1), 0)
    valid = (row < t_real).astype(jnp.float32)
    psum = jnp.sum(probs * valid, axis=0)                                 # [E]
    psum_ref[...] = jnp.broadcast_to(psum[None, None, :], (1, 8, E))

    # ---- per-block combine coefficients -> lane-dense [tm, NBI] scale ----
    #   shared block: w0 ; expert block e: w1 * probs_e
    scale = (w[:, 0:1] * sshared_ref[...]
             + jnp.dot(w[:, 1:2] * probs, sexp_ref[...],
                       preferred_element_type=jnp.float32))               # [tm, NBI]

    # ---- single fused down-projection over K = NBI -----------------------
    hs = (h * scale).astype(wd_ref.dtype)
    out = jnp.dot(hs, wd_ref[...], preferred_element_type=jnp.float32)    # [tm, H]
    out_ref[...] = out.astype(out_ref.dtype)


def combined_layer(x, params, *, compute_dtype=None, tm_max=TM_MAX):
    """x: [B, S, H] -> (combined_out [B, S, H], aux_loss scalar)."""
    B, S, h = x.shape
    assert h == H
    T = B * S
    if compute_dtype is None:
        compute_dtype = x.dtype

    xf = x.reshape(T, H)
    tm = max(8, min(_round_up(tm_max, 8), _round_up(T, 8)))
    t_pad = _round_up(T, tm)
    if t_pad != T:
        xf = jnp.pad(xf, ((0, t_pad - T), (0, 0)))
    num_tiles = t_pad // tm

    # ---- fused weights (tiny; constant-folded under jit) ------------------
    wg_all = jnp.concatenate([params["wg"]] + [params["ewg"][e] for e in range(E)],
                             axis=1).astype(compute_dtype)                # [H, NBI]
    wu_all = jnp.concatenate([params["wu"]] + [params["ewu"][e] for e in range(E)],
                             axis=1).astype(compute_dtype)                # [H, NBI]
    wd_all = jnp.concatenate([params["wd"]] + [params["ewd"][e] for e in range(E)],
                             axis=0).astype(compute_dtype)                # [NBI, H]
    wrg = jnp.concatenate([params["wr"], params["wgate"]],
                          axis=1).astype(jnp.float32)                     # [H, E+2]
    blocks = jnp.kron(jnp.eye(NB, dtype=jnp.float32),
                      jnp.ones((1, I), jnp.float32))                      # [NB, NBI]
    s_shared = blocks[0:1]                                                # [1, NBI]
    s_exp = blocks[1:]                                                    # [E, NBI]

    out, psums = pl.pallas_call(
        functools.partial(combined_kernel, tm=tm, t_real=T),
        out_shape=(jax.ShapeDtypeStruct((t_pad, H), x.dtype),
                   jax.ShapeDtypeStruct((num_tiles, 8, E), jnp.float32)),
        grid_spec=pltpu.PrefetchScalarGridSpec(
            num_scalar_prefetch=0,
            grid=(num_tiles,),
            in_specs=[
                pl.BlockSpec((tm, H), lambda i: (i, 0)),          # x tile
                pl.BlockSpec((H, NBI), lambda i: (0, 0)),         # fused gate proj
                pl.BlockSpec((H, NBI), lambda i: (0, 0)),         # fused up proj
                pl.BlockSpec((H, E + 2), lambda i: (0, 0)),       # router + ds gate
                pl.BlockSpec((1, NBI), lambda i: (0, 0)),         # shared-block mask
                pl.BlockSpec((E, NBI), lambda i: (0, 0)),         # expert-block expand
                pl.BlockSpec((NBI, H), lambda i: (0, 0)),         # fused down proj
            ],
            out_specs=[
                pl.BlockSpec((tm, H), lambda i: (i, 0)),
                pl.BlockSpec((1, 8, E), lambda i: (i, 0, 0)),
            ],
        ),
        compiler_params=pltpu.CompilerParams(
            dimension_semantics=("parallel",)),
    )(xf, wg_all, wu_all, wrg, s_shared, s_exp, wd_all)

    combined = out[:T].reshape(B, S, H)
    # MoE aux (Switch-style soft load-balance) from in-kernel masked prob sums.
    probs_mean = jnp.sum(psums[:, 0, :], axis=0) / T
    moe_aux = E * jnp.sum(probs_mean ** 2)
    return combined, moe_aux


def reference(x, params):
    """Plain-JAX reference mirroring the PyTorch CombinedLayer semantics."""
    xf = x.reshape(-1, H).astype(jnp.float32)
    g = xf @ params["wg"]
    u = xf @ params["wu"]
    mlp_out = (_silu(g) * u) @ params["wd"]

    probs = jax.nn.softmax(xf @ params["wr"], axis=-1)
    moe_out = jnp.zeros_like(mlp_out)
    for e in range(E):
        he = _silu(xf @ params["ewg"][e]) * (xf @ params["ewu"][e])
        moe_out = moe_out + probs[:, e:e + 1] * (he @ params["ewd"][e])
    moe_aux = E * jnp.sum(jnp.mean(probs, axis=0) ** 2)

    w = jax.nn.softmax(xf @ params["wgate"], axis=-1)
    combined = w[:, 0:1] * mlp_out + w[:, 1:2] * moe_out
    return combined.reshape(x.shape), moe_aux


def init_params(key):
    ks = jax.random.split(key, 9)
    s = 0.05
    return {
        "wg":    s * jax.random.normal(ks[0], (H, I), jnp.float32),
        "wu":    s * jax.random.normal(ks[1], (H, I), jnp.float32),
        "wd":    s * jax.random.normal(ks[2], (I, H), jnp.float32),
        "wr":    s * jax.random.normal(ks[3], (H, E), jnp.float32),
        "ewg":   s * jax.random.normal(ks[4], (E, H, I), jnp.float32),
        "ewu":   s * jax.random.normal(ks[5], (E, H, I), jnp.float32),
        "ewd":   s * jax.random.normal(ks[6], (E, I, H), jnp.float32),
        "wgate": s * jax.random.normal(ks[7], (H, 2), jnp.float32),
    }


if __name__ == "__main__":
    key = jax.random.PRNGKey(0)
    pkey, xkey, xkey2 = jax.random.split(key, 3)
    params = init_params(pkey)

    # small demo shape consistent with the module: batch=2, seq=8, hidden=32
    B, S = 2, 8
    x = jax.random.normal(xkey, (B, S, H), jnp.float32)

    out, aux = combined_layer(x, params)
    out = jax.block_until_ready(out)
    aux = jax.block_until_ready(aux)

    ref_out, ref_aux = reference(x, params)
    np.testing.assert_allclose(np.asarray(out), np.asarray(ref_out),
                               rtol=1e-4, atol=1e-5)
    np.testing.assert_allclose(float(aux), float(ref_aux),
                               rtol=1e-4, atol=1e-6)

    # multi-tile + padding path: 100 tokens, tile=64 -> 2 tiles, 28 pad rows
    x2 = jax.random.normal(xkey2, (4, 25, H), jnp.float32)
    out2, aux2 = combined_layer(x2, params, tm_max=64)
    out2 = jax.block_until_ready(out2)
    ref_out2, ref_aux2 = reference(x2, params)
    np.testing.assert_allclose(np.asarray(out2), np.asarray(ref_out2),
                               rtol=1e-4, atol=1e-5)
    np.testing.assert_allclose(float(aux2), float(ref_aux2),
                               rtol=1e-4, atol=1e-6)

    # bf16 MXU path (v6e/v7x fast path): smoke check with loose bound.
    out_bf16, aux_bf16 = combined_layer(x, params, compute_dtype=jnp.bfloat16)
    out_bf16 = jax.block_until_ready(out_bf16)
    assert bool(jnp.all(jnp.isfinite(out_bf16)))
    assert float(jnp.max(jnp.abs(out_bf16 - ref_out))) < 5e-2

    print("KERNEL_OK")
</pallas_src>

<mosaic_0001>
module attributes {stable_mosaic.version = 11 : i64} {
  func.func @combined_kernel(%arg0: i32, %arg1: memref<16x32xf32, #tpu.memory_space<vmem>>, %arg2: memref<32x320xf32, #tpu.memory_space<vmem>>, %arg3: memref<32x320xf32, #tpu.memory_space<vmem>>, %arg4: memref<32x6xf32, #tpu.memory_space<vmem>>, %arg5: memref<1x320xf32, #tpu.memory_space<vmem>>, %arg6: memref<4x320xf32, #tpu.memory_space<vmem>>, %arg7: memref<320x32xf32, #tpu.memory_space<vmem>>, %arg8: memref<16x32xf32, #tpu.memory_space<vmem>>, %arg9: memref<1x8x4xf32, #tpu.memory_space<vmem>>) attributes {dimension_semantics = [#tpu.dimension_semantics<parallel>], iteration_bounds = array<i64: 1>, scalar_prefetch = 0 : i64, scratch_operands = 0 : i64, tpu.core_type = #tpu.core_type<tc>, window_params = [{transform_indices = @transform_0, window_bounds = array<i64: 16, 32>}, {pipeline_mode = #tpu.pipeline_mode<synchronous>, transform_indices = @transform_1, window_bounds = array<i64: 32, 320>}, {pipeline_mode = #tpu.pipeline_mode<synchronous>, transform_indices = @transform_2, window_bounds = array<i64: 32, 320>}, {pipeline_mode = #tpu.pipeline_mode<synchronous>, transform_indices = @transform_3, window_bounds = array<i64: 32, 6>}, {pipeline_mode = #tpu.pipeline_mode<synchronous>, transform_indices = @transform_4, window_bounds = array<i64: 1, 320>}, {pipeline_mode = #tpu.pipeline_mode<synchronous>, transform_indices = @transform_5, window_bounds = array<i64: 4, 320>}, {pipeline_mode = #tpu.pipeline_mode<synchronous>, transform_indices = @transform_6, window_bounds = array<i64: 320, 32>}, {transform_indices = @transform_7, window_bounds = array<i64: 16, 32>}, {transform_indices = @transform_8, window_bounds = array<i64: 1, 8, 4>}]} {
    %c0 = arith.constant 0 : index
    %c0_0 = arith.constant 0 : index
    %0 = vector.load %arg1[%c0, %c0_0] : memref<16x32xf32, #tpu.memory_space<vmem>>, vector<16x32xf32>
    %c0_1 = arith.constant 0 : index
    %c0_2 = arith.constant 0 : index
    %1 = vector.load %arg2[%c0_1, %c0_2] : memref<32x320xf32, #tpu.memory_space<vmem>>, vector<32x320xf32>
    %cst = arith.constant dense<0.000000e+00> : vector<16x320xf32>
    %2 = tpu.matmul %0, %1, %cst {dimension_numbers = #tpu.dot_dimension_numbers<[1], [0], [0], [1], [0, 0, 1, 1], [], []>} : vector<16x32xf32>, vector<32x320xf32>, vector<16x320xf32> -> vector<16x320xf32>
    %c0_3 = arith.constant 0 : index
    %c0_4 = arith.constant 0 : index
    %3 = vector.load %arg3[%c0_3, %c0_4] : memref<32x320xf32, #tpu.memory_space<vmem>>, vector<32x320xf32>
    %cst_5 = arith.constant dense<0.000000e+00> : vector<16x320xf32>
    %4 = tpu.matmul %0, %3, %cst_5 {dimension_numbers = #tpu.dot_dimension_numbers<[1], [0], [0], [1], [0, 0, 1, 1], [], []>} : vector<16x32xf32>, vector<32x320xf32>, vector<16x320xf32> -> vector<16x320xf32>
    %5 = arith.negf %2 : vector<16x320xf32>
    %6 = math.exp %5 : vector<16x320xf32>
    %cst_6 = arith.constant 1.000000e+00 : f32
    %7 = vector.broadcast %cst_6 : f32 to vector<16x320xf32>
    %8 = arith.addf %7, %6 : vector<16x320xf32>
    %9 = arith.divf %7, %8 : vector<16x320xf32>
    %10 = arith.mulf %2, %9 : vector<16x320xf32>
    %11 = arith.mulf %10, %4 : vector<16x320xf32>
    %c0_7 = arith.constant 0 : index
    %c0_8 = arith.constant 0 : index
    %12 = vector.load %arg4[%c0_7, %c0_8] : memref<32x6xf32, #tpu.memory_space<vmem>>, vector<32x6xf32>
    %cst_9 = arith.constant dense<0.000000e+00> : vector<16x6xf32>
    %13 = tpu.matmul %0, %12, %cst_9 {dimension_numbers = #tpu.dot_dimension_numbers<[1], [0], [0], [1], [0, 0, 1, 1], [], []>} : vector<16x32xf32>, vector<32x6xf32>, vector<16x6xf32> -> vector<16x6xf32>
    %14 = vector.extract_strided_slice %13 {offsets = [0, 0], sizes = [16, 4], strides = [1, 1]} : vector<16x6xf32> to vector<16x4xf32>
    %cst_10 = arith.constant dense<0xFF800000> : vector<16xf32>
    %15 = vector.multi_reduction <maximumf>, %14, %cst_10 [1] : vector<16x4xf32> to vector<16xf32>
    %cst_11 = arith.constant 0xFF800000 : f32
    %16 = vector.broadcast %cst_11 : f32 to vector<16xf32>
    %17 = arith.maximumf %16, %15 : vector<16xf32>
    %18 = vector.shape_cast %17 : vector<16xf32> to vector<16x1xf32>
    %19 = vector.broadcast %18 : vector<16x1xf32> to vector<16x4xf32>
    %20 = arith.subf %14, %19 : vector<16x4xf32>
    %21 = math.exp %20 : vector<16x4xf32>
    %cst_12 = arith.constant dense<0.000000e+00> : vector<16xf32>
    %22 = vector.multi_reduction <add>, %21, %cst_12 [1] : vector<16x4xf32> to vector<16xf32>
    %23 = vector.shape_cast %22 : vector<16xf32> to vector<16x1xf32>
    %24 = vector.broadcast %23 : vector<16x1xf32> to vector<16x4xf32>
    %25 = arith.divf %21, %24 : vector<16x4xf32>
    %26 = vector.extract_strided_slice %13 {offsets = [0, 4], sizes = [16, 2], strides = [1, 1]} : vector<16x6xf32> to vector<16x2xf32>
    %cst_13 = arith.constant dense<0xFF800000> : vector<16xf32>
    %27 = vector.multi_reduction <maximumf>, %26, %cst_13 [1] : vector<16x2xf32> to vector<16xf32>
    %cst_14 = arith.constant 0xFF800000 : f32
    %28 = vector.broadcast %cst_14 : f32 to vector<16xf32>
    %29 = arith.maximumf %28, %27 : vector<16xf32>
    %30 = vector.shape_cast %29 : vector<16xf32> to vector<16x1xf32>
    %31 = vector.broadcast %30 : vector<16x1xf32> to vector<16x2xf32>
    %32 = arith.subf %26, %31 : vector<16x2xf32>
    %33 = math.exp %32 : vector<16x2xf32>
    %cst_15 = arith.constant dense<0.000000e+00> : vector<16xf32>
    %34 = vector.multi_reduction <add>, %33, %cst_15 [1] : vector<16x2xf32> to vector<16xf32>
    %35 = vector.shape_cast %34 : vector<16xf32> to vector<16x1xf32>
    %36 = vector.broadcast %35 : vector<16x1xf32> to vector<16x2xf32>
    %37 = arith.divf %33, %36 : vector<16x2xf32>
    %c16_i32 = arith.constant 16 : i32
    %38 = arith.muli %arg0, %c16_i32 : i32
    %39 = tpu.iota {dimensions = array<i32: 0>} : vector<16x1xi32>
    %40 = vector.broadcast %38 : i32 to vector<16x1xi32>
    %41 = arith.addi %40, %39 : vector<16x1xi32>
    %c16_i32_16 = arith.constant 16 : i32
    %42 = vector.broadcast %c16_i32_16 : i32 to vector<16x1xi32>
    %43 = arith.cmpi slt, %41, %42 : vector<16x1xi32>
    %44 = arith.extui %43 : vector<16x1xi1> to vector<16x1xi32>
    %45 = arith.sitofp %44 : vector<16x1xi32> to vector<16x1xf32>
    %46 = vector.broadcast %45 : vector<16x1xf32> to vector<16x4xf32>
    %47 = arith.mulf %25, %46 : vector<16x4xf32>
    %cst_17 = arith.constant dense<0.000000e+00> : vector<4xf32>
    %48 = vector.multi_reduction <add>, %47, %cst_17 [0] : vector<16x4xf32> to vector<4xf32>
    %49 = vector.shape_cast %48 : vector<4xf32> to vector<1x1x4xf32>
    %50 = vector.shape_cast %49 : vector<1x1x4xf32> to vector<1x1x4xf32>
    %51 = vector.broadcast %50 : vector<1x1x4xf32> to vector<1x8x4xf32>
    %c0_18 = arith.constant 0 : index
    %c0_19 = arith.constant 0 : index
    %c0_20 = arith.constant 0 : index
    %52 = vector.load %arg9[%c0_18, %c0_19, %c0_20] : memref<1x8x4xf32, #tpu.memory_space<vmem>>, vector<1x8x4xf32>
    tpu.vector_store %arg9[%c0_18, %c0_19, %c0_20], %51 {strides = array<i32>} : memref<1x8x4xf32, #tpu.memory_space<vmem>>, vector<1x8x4xf32>,
    %53 = vector.extract_strided_slice %37 {offsets = [0, 0], sizes = [16, 1], strides = [1, 1]} : vector<16x2xf32> to vector<16x1xf32>
    %c0_21 = arith.constant 0 : index
    %c0_22 = arith.constant 0 : index
    %54 = vector.load %arg5[%c0_21, %c0_22] : memref<1x320xf32, #tpu.memory_space<vmem>>, vector<1x320xf32>
    %55 = vector.broadcast %53 : vector<16x1xf32> to vector<16x320xf32>
    %56 = vector.broadcast %54 : vector<1x320xf32> to vector<16x320xf32>
    %57 = arith.mulf %55, %56 : vector<16x320xf32>
    %58 = vector.extract_strided_slice %37 {offsets = [0, 1], sizes = [16, 1], strides = [1, 1]} : vector<16x2xf32> to vector<16x1xf32>
    %59 = vector.broadcast %58 : vector<16x1xf32> to vector<16x4xf32>
    %60 = arith.mulf %59, %25 : vector<16x4xf32>
    %c0_23 = arith.constant 0 : index
    %c0_24 = arith.constant 0 : index
    %61 = vector.load %arg6[%c0_23, %c0_24] : memref<4x320xf32, #tpu.memory_space<vmem>>, vector<4x320xf32>
    %cst_25 = arith.constant dense<0.000000e+00> : vector<16x320xf32>
    %62 = tpu.matmul %60, %61, %cst_25 {dimension_numbers = #tpu.dot_dimension_numbers<[1], [0], [0], [1], [0, 0, 1, 1], [], []>} : vector<16x4xf32>, vector<4x320xf32>, vector<16x320xf32> -> vector<16x320xf32>
    %63 = arith.addf %57, %62 : vector<16x320xf32>
    %64 = arith.mulf %11, %63 : vector<16x320xf32>
    %c0_26 = arith.constant 0 : index
    %c0_27 = arith.constant 0 : index
    %65 = vector.load %arg7[%c0_26, %c0_27] : memref<320x32xf32, #tpu.memory_space<vmem>>, vector<320x32xf32>
    %cst_28 = arith.constant dense<0.000000e+00> : vector<16x32xf32>
    %66 = tpu.matmul %64, %65, %cst_28 {dimension_numbers = #tpu.dot_dimension_numbers<[1], [0], [0], [1], [0, 0, 1, 1], [], []>} : vector<16x320xf32>, vector<320x32xf32>, vector<16x32xf32> -> vector<16x32xf32>
    %c0_29 = arith.constant 0 : index
    %c0_30 = arith.constant 0 : index
    %67 = vector.load %arg8[%c0_29, %c0_30] : memref<16x32xf32, #tpu.memory_space<vmem>>, vector<16x32xf32>
    tpu.vector_store %arg8[%c0_29, %c0_30], %66 {strides = array<i32>} : memref<16x32xf32, #tpu.memory_space<vmem>>, vector<16x32xf32>,
    return
  }
  func.func @transform_0(%arg0: i32) -> (i32, i32) {
    %c0_i32 = arith.constant 0 : i32
    %c0_i32_0 = arith.constant 0 : i32
    return %arg0, %c0_i32 : i32, i32
  }
  func.func @transform_1(%arg0: i32) -> (i32, i32) {
    %c0_i32 = arith.constant 0 : i32
    %c0_i32_0 = arith.constant 0 : i32
    %c0_i32_1 = arith.constant 0 : i32
    return %c0_i32, %c0_i32_0 : i32, i32
  }
  func.func @transform_2(%arg0: i32) -> (i32, i32) {
    %c0_i32 = arith.constant 0 : i32
    %c0_i32_0 = arith.constant 0 : i32
    %c0_i32_1 = arith.constant 0 : i32
    return %c0_i32, %c0_i32_0 : i32, i32
  }
  func.func @transform_3(%arg0: i32) -> (i32, i32) {
    %c0_i32 = arith.constant 0 : i32
    %c0_i32_0 = arith.constant 0 : i32
    %c0_i32_1 = arith.constant 0 : i32
    return %c0_i32, %c0_i32_0 : i32, i32
  }
  func.func @transform_4(%arg0: i32) -> (i32, i32) {
    %c0_i32 = arith.constant 0 : i32
    %c0_i32_0 = arith.constant 0 : i32
    %c0_i32_1 = arith.constant 0 : i32
    return %c0_i32, %c0_i32_0 : i32, i32
  }
  func.func @transform_5(%arg0: i32) -> (i32, i32) {
    %c0_i32 = arith.constant 0 : i32
    %c0_i32_0 = arith.constant 0 : i32
    %c0_i32_1 = arith.constant 0 : i32
    return %c0_i32, %c0_i32_0 : i32, i32
  }
  func.func @transform_6(%arg0: i32) -> (i32, i32) {
    %c0_i32 = arith.constant 0 : i32
    %c0_i32_0 = arith.constant 0 : i32
    %c0_i32_1 = arith.constant 0 : i32
    return %c0_i32, %c0_i32_0 : i32, i32
  }
  func.func @transform_7(%arg0: i32) -> (i32, i32) {
    %c0_i32 = arith.constant 0 : i32
    %c0_i32_0 = arith.constant 0 : i32
    return %arg0, %c0_i32 : i32, i32
  }
  func.func @transform_8(%arg0: i32) -> (i32, i32, i32) {
    %c0_i32 = arith.constant 0 : i32
    %c0_i32_0 = arith.constant 0 : i32
    %c0_i32_1 = arith.constant 0 : i32
    return %arg0, %c0_i32, %c0_i32_0 : i32, i32, i32
  }
}

</mosaic_0001>

<bundles_post_ra>
// kernel: tpu_custom_call.1
= control target key start
LH: loop header
LB: loop body
LE: loop exit
PB: predicated region body
PF: predicated region fallthrough
CT: control target
= control target key end

     0   :  { %v1331_v7 = vmov 0.0   ;;  %vm43_vm0 = vcmask 261120   ;;  %s1675_s0 = inlined_call_operand.vmem [shape: f32[16,32], index: 0, kind: input, shape index: {}]   ;;  %s1676_s1 = inlined_call_operand.vmem [shape: f32[32,320], index: 1, kind: input, shape index: {}]   ;;  %s1677_s2 = inlined_call_operand.vmem [shape: f32[32,320], index: 2, kind: input, shape index: {}]   ;;  %s1678_s3 = inlined_call_operand.vmem [shape: f32[32,6], index: 3, kind: input, shape index: {}]   ;;  %s1679_s4 = inlined_call_operand.vmem [shape: f32[1,320], index: 4, kind: input, shape index: {}]   ;;  %s1680_s5 = inlined_call_operand.vmem [shape: f32[4,320], index: 5, kind: input, shape index: {}]   ;;  %s1681_s6 = inlined_call_operand.vmem [shape: f32[320,32], index: 6, kind: input, shape index: {}]   ;;  %s1682_s7 = inlined_call_operand.hbm [shape: f32[16,32], index: 7, kind: output, shape index: {0}]   ;;  %s1683_s8 = inlined_call_operand.vmem [shape: f32[1,8,4], index: 8, kind: output, shape index: {1}]  }
   0x1   :  { %v32_v0 = vld [vmem:[%s1676_s1 + $0x8] sm:$0xff]  ;;  %v35_v1 = vld [vmem:[%s1676_s1 + $0x20] sm:$0xff]  ;;  %v34_v4 = vld [vmem:[%s1676_s1 + $0x18] sm:$0xff]  ;;  %114 = vmatprep.mubr.f32.mxu0 %v1331_v7 }
   0x2   :  { %v31_v2 = vld [vmem:[%s1676_s1] sm:$0xff]  ;;  %v1168_v3 = vpack.c.bf16 %v35_v1, %v32_v0  ;;  %v38_v5 = vld [vmem:[%s1676_s1 + $0x38] sm:$0xff]  ;;  %v41_v6 = vld [vmem:[%s1676_s1 + $0x50] sm:$0xff] }
   0x3   :  { %v1170_v8 = vpack.c.bf16 %v34_v4, %v31_v2  ;;  %v1172_v9 = vpack.c.bf16 %v41_v6, %v38_v5  ;;  %v37_v10 = vld [vmem:[%s1676_s1 + $0x30] sm:$0xff]  ;;  %v40_v11 = vld [vmem:[%s1676_s1 + $0x48] sm:$0xff]  ;;  %v1411_v12 = vld [vmem:[%s1675_s0] sm:$0xff] }
   0x4   :  { %1169 = vmatprep.subr.bf16.mxu0 %v1168_v3  ;;  %v33_v13 = vld [vmem:[%s1676_s1 + $0x10] sm:$0xff]  ;;  %v36_v14 = vld [vmem:[%s1676_s1 + $0x28] sm:$0xff]  ;;  %1130 = vmatprep.mubr.msk.f32.mxu1 %vm43_vm0, %v1411_v12  ;;  %v1174_v15 = vpack.c.bf16 %v40_v11, %v37_v10  ;;  %v39_v17 = vld [vmem:[%s1676_s1 + $0x40] sm:$0xff] }
   0x5   :  { %1171 = vmatpush1.bf16.msra.mxu0 %v1170_v8  ;;  %v1176_v16 = vpack.c.bf16 %v36_v14, %v33_v13  ;;  %v42_v18 = vld [vmem:[%s1676_s1 + $0x58] sm:$0xff]  ;;  %v204_v19 = vld [vmem:[%s1677_s2 + $0x10] sm:$0xff]  ;;  %v207_v21 = vld [vmem:[%s1677_s2 + $0x28] sm:$0xff] }
   0x6   :  { %1173 = vmatprep.subr.bf16.mxu0 %v1172_v9  ;;  %v1180_v20 = vpack.c.bf16 %v42_v18, %v39_v17  ;;  %v210_v22 = vld [vmem:[%s1677_s2 + $0x40] sm:$0xff]  ;;  %v213_v23 = vld [vmem:[%s1677_s2 + $0x58] sm:$0xff]  ;;  %v203_v24 = vld [vmem:[%s1677_s2 + $0x8] sm:$0xff]  ;;  %v1192_v26 = vpack.c.bf16 %v207_v21, %v204_v19 }
   0x7   :  { %v206_v25 = vld [vmem:[%s1677_s2 + $0x20] sm:$0xff] }
   0x9   :  { %1175 = vmatpush1.bf16.msra.mxu0 %v1174_v15 }
   0xa   :  { %1177 = vmatprep.subr.bf16.mxu0 %v1176_v16 }
   0xb   :  { %14 = vsyncpa [#allocation3], 0  ;;  %v1196_v27 = vpack.c.bf16 %v213_v23, %v210_v22  ;;  %v30_v28 = vld [vmem:[%s1675_s0 + $0x8] sm:$0xff]  ;;  %v1184_v29 = vpack.c.bf16 %v206_v25, %v203_v24  ;;  %v202_v30 = vld [vmem:[%s1677_s2] sm:$0xff]  ;;  %1193 = vmatprep.subr.bf16.mxu1 %v1192_v26  ;;  %vm516_vm1 = vcmask 48160   ;;  %vm493_vm2 = vcmask 31744  }
   0xc   :  { %1017 = vmatmul.mubr.msk.f32.vlgmr.msra.gmra.mrb[0].mxu0 %vm43_vm0, %v1411_v12  ;;  %v205_v31 = vld [vmem:[%s1677_s2 + $0x18] sm:$0xff]  ;;  %v212_v33 = vld [vmem:[%s1677_s2 + $0x50] sm:$0xff]  ;;  %1195 = vmatpush3.bf16.msra.mxu1 %v1192_v26  ;;  %v211_v37 = vld [vmem:[%s1677_s2 + $0x48] sm:$0xff]  ;;  %vm537_vm3 = vcmask 15360   ;;  %vm627_vm4 = vcmask 1043456   ;;  %vm838_vm5 = vcmask 523264  }
   0xd   :  { %1179 = vmatpush3.bf16.msra.mxu0 %v1176_v16  ;;  %120 = vmatprep.mubr.f32.mxu0 %v1331_v7  ;;  %v209_v32 = vld [vmem:[%s1677_s2 + $0x38] sm:$0xff]  ;;  %v1186_v34 = vpack.c.bf16 %v205_v31, %v202_v30  ;;  %v208_v36 = vld [vmem:[%s1677_s2 + $0x30] sm:$0xff]  ;;  %v414_v38 = vld [vmem:[%s1678_s3] sm:$0xff] }
   0xe   :  { %1181 = vmatprep.subr.bf16.mxu0 %v1180_v20  ;;  %1197 = vmatprep.subr.bf16.mxu1 %v1196_v27  ;;  %v1188_v35 = vpack.c.bf16 %v212_v33, %v209_v32  ;;  %v415_v39 = vld [vmem:[%s1678_s3 + $0x8] sm:$0xff]  ;;  %v1190_v40 = vpack.c.bf16 %v211_v37, %v208_v36  ;;  %v416_v42 = vld [vmem:[%s1678_s3 + $0x10] sm:$0xff]  ;;  %v417_v43 = vld [vmem:[%s1678_s3 + $0x18] sm:$0xff]  ;;  %s1332_s3 = smov 124  }
   0xf   :  { %v1200_v41 = vpack.c.bf16 %v415_v39, %v414_v38  ;;  %v1204_v44 = vpack.c.bf16 %v417_v43, %v416_v42 }
  0x10   :  { %1018 = vmatmul.mubr.msk.f32.gmra.mrb[2].mxu0 %vm43_vm0, %v30_v28  ;;  %1199 = vmatpush3.bf16.msra.mxu1 %v1196_v27 }
  0x11   :  { %1183 = vmatpush3.bf16.msra.mxu0 %v1180_v20  ;;  %1119 = vmatprep.mubr.msk.f32.mxu0 %vm43_vm0, %v1411_v12 }
  0x12   :  { %1185 = vmatprep.subr.bf16.mxu0 %v1184_v29 }
  0x13   :  { %1131 = vmatmul.mubr.msk.f32.vlgmr.msra.gmra.mrb[0].mxu1 %vm43_vm0, %v30_v28 }
  0x14   :  { %1120 = vmatmul.mubr.msk.f32.vlgmr.msra.gmra.mrb[4].mxu0 %vm43_vm0, %v30_v28  ;;  %698 = vmatprep.mubr.f32.mxu1 %v1331_v7 }
  0x15   :  { %1187 = vmatpush1.bf16.msra.mxu0 %v1186_v34  ;;  %278 = vmatprep.mubr.f32.mxu0 %v1331_v7 }
  0x16   :  { %1189 = vmatprep.subr.bf16.mxu0 %v1188_v35 }
  0x19   :  { %1191 = vmatpush1.bf16.msra.mxu0 %v1190_v40 }
  0x1a   :  { %1201 = vmatprep.subr.bf16.mxu0 %v1200_v41 }
  0x1c   :  { %1021 = vmatmul.mubr.msk.f32.vlgmr.msra.gmra.mrb[6].mxu0 %vm43_vm0, %v1411_v12 }
  0x1d   :  { %1203 = vmatpush3.bf16.msra.mxu0 %v1200_v41  ;;  %284 = vmatprep.mubr.f32.mxu0 %v1331_v7 }
  0x1e   :  { %1205 = vmatprep.subr.bf16.mxu0 %v1204_v44 }
  0x20   :  { %1022 = vmatmul.mubr.msk.f32.gmra.mrb[8].mxu0 %vm43_vm0, %v30_v28 }
  0x21   :  { %1207 = vmatpush3.bf16.msra.mxu0 %v1204_v44  ;;  %1141 = vmatprep.mubr.msk.f32.mxu0 %vm43_vm0, %v1411_v12 }
  0x24   :  { %1142 = vmatmul.mubr.msk.f32.vlgmr.msra.gmra.mrb[10].mxu0 %vm43_vm0, %v30_v28 }
  0xdf   :  { %v116_v45 = vpop.f32.mrb[0].mxu0 }
  0xe0   :  { %v1025_v46 = vmul.f32 -1.442695, %v116_v45  ;;  %v118_v47 = vpop.f32.mrb[1].mxu0 }
  0xe1   :  { %v1026_v48 = vmul.f32 -1.442695, %v118_v47 }
  0xe2   :  { %1267 = vpow2.f32 %v1025_v46 }
  0xe3   :  { %1269 = vpow2.f32 %v1026_v48  ;;  %v122_v49 = vpop.f32.mrb[2].mxu0 }
  0xe4   :  { %v1028_v50 = vmul.f32 -1.442695, %v122_v49  ;;  %v124_v51 = vpop.f32.mrb[3].mxu0 }
  0xe5   :  { %v1029_v52 = vmul.f32 -1.442695, %v124_v51 }
  0xe6   :  { %1271 = vpow2.f32 %v1028_v50  ;;  %v1132_v57 = vpop.f32.mrb[0].mxu1 }
  0xe7   :  { %1273 = vpow2.f32 %v1029_v52  ;;  %v1121_v53 = vpop.f32.mrb[4].mxu0  ;;  %v357_v58 = vpop.f32.mrb[1].mxu1 }
  0xe8   :  { %v1030_v54 = vmul.f32 -1.442695, %v1121_v53  ;;  %v193_v55 = vpop.f32.mrb[5].mxu0 }
  0xe9   :  { %v1027_v56 = vmul.f32 -1.442695, %v193_v55 }
  0xea   :  { %1275 = vpow2.f32 %v1030_v54 }
  0xeb   :  { %1277 = vpow2.f32 %v1027_v56 }
  0xec   :  { %v1268_v59 = vpop.eup %1267 }
  0xed   :  { %v1270_v60 = vpop.eup %1269  ;;  %v384_v61 = vadd.f32 1.0, %v1268_v59  ;;  %v616_v59 = vld [vmem:[%s1680_s5] sm:$0xff] }
  0xee   :  { %v385_v62 = vadd.f32 1.0, %v1270_v60  ;;  %v620_v60 = vcombine.high %v616_v59, %v616_v59 }
  0xef   :  { %1279 = vrcp.f32 %v384_v61  ;;  %v280_v63 = vpop.f32.mrb[6].mxu0 }
  0xf0   :  { %v1272_v0 = vpop.eup %1271  ;;  %1281 = vrcp.f32 %v385_v62  ;;  %v282_v1 = vpop.f32.mrb[7].mxu0  ;;  %1033 = vmatprep.subr.msk.mxu1 %vm627_vm4, %v620_v60  ;;  %v823_v60 = vld [vmem:[%s1681_s6 + $0xc8] sm:$0xff] }
  0xf1   :  { %v1274_v2 = vpop.eup %1273  ;;  %v387_v3 = vadd.f32 1.0, %v1272_v0  ;;  %1034 = vmatpush1.msk.msra.mxu1 %vm627_vm4, %v616_v59  ;;  %v822_v59 = vld [vmem:[%s1681_s6 + $0xc0] sm:$0xff] }
  0xf2   :  { %v388_v4 = vadd.f32 1.0, %v1274_v2 }
  0xf3   :  { %1283 = vrcp.f32 %v387_v3  ;;  %v286_v5 = vpop.f32.mrb[8].mxu0  ;;  %v617_v3 = vld [vmem:[%s1680_s5 + $0x8] sm:$0xf] }
  0xf4   :  { %v1276_v6 = vpop.eup %1275  ;;  %1285 = vrcp.f32 %v388_v4  ;;  %v288_v8 = vpop.f32.mrb[9].mxu0  ;;  %1144 = vmatprep.subr.msk.mxu0 %vm627_vm4, %v617_v3  ;;  %v1334_v4 = vmov 4  }
  0xf5   :  { %v1278_v9 = vpop.eup %1277  ;;  %v389_v10 = vadd.f32 1.0, %v1276_v6  ;;  %1145 = vmatpush3.msk.msra.mxu0 %vm627_vm4, %v617_v3  ;;  %v815_v6 = vld [vmem:[%s1681_s6 + $0x88] sm:$0xff] }
  0xf6   :  { %v386_v11 = vadd.f32 1.0, %v1278_v9  ;;  %v830_v9 = vld [vmem:[%s1681_s6 + $0x100] sm:$0xff] }
  0xf7   :  { %1287 = vrcp.f32 %v389_v10  ;;  %v1143_v12 = vpop.f32.mrb[10].mxu0  ;;  %v831_v10 = vld [vmem:[%s1681_s6 + $0x108] sm:$0xff] }
  0xf8   :  { %1289 = vrcp.f32 %v386_v11  ;;  %v484_v13 = vpop.f32.mrb[11].mxu0  ;;  %v520_v22 = vsel %vm516_vm1, %v1143_v12, -inf  ;;  %v497_v43 = vsel %vm493_vm2, %v1143_v12, -inf  ;;  %v1240_v11 = vpack.c.bf16 %v831_v10, %v830_v9  ;;  %v827_v9 = vld [vmem:[%s1681_s6 + $0xe8] sm:$0xff] }
  0xf9   :  { %v1280_v14 = vpop.eup %1279  ;;  %v517_v15 = vsel %vm516_vm1, %v484_v13, -inf  ;;  %v494_v29 = vsel %vm493_vm2, %v484_v13, -inf }
  0xfa   :  { %v1282_v16 = vpop.eup %1281  ;;  %v402_v17 = vmul.f32 %v1280_v14, %v116_v45  ;;  %518 = vmax.xlane.f32.xlu0 %v517_v15  ;;  %1241 = vmatprep.subr.bf16.mxu0 %v1240_v11 }
  0xfb   :  { %v403_v18 = vmul.f32 %v1282_v16, %v118_v47 }
  0xfc   :  { %v1495_v19 = vmul.f32 %v402_v17, %v280_v63 }
  0xfd   :  { %v1284_v20 = vpop.eup %1283  ;;  %v1497_v21 = vmul.f32 %v403_v18, %v282_v1 }
  0xfe   :  { %v1286_v23 = vpop.eup %1285  ;;  %v405_v24 = vmul.f32 %v1284_v20, %v122_v49  ;;  %521 = vmax.xlane.f32.xlu0 %v520_v22 }
  0xff   :  { %v406_v25 = vmul.f32 %v1286_v23, %v124_v51 }
 0x100   :  { %v1499_v26 = vmul.f32 %v405_v24, %v286_v5  ;;  %v814_v5 = vld [vmem:[%s1681_s6 + $0x80] sm:$0xff] }
 0x101   :  { %v1288_v27 = vpop.eup %1287  ;;  %v1501_v28 = vmul.f32 %v406_v25, %v288_v8  ;;  %v1208_v8 = vpack.c.bf16 %v815_v6, %v814_v5  ;;  %v808_v5 = vld [vmem:[%s1681_s6 + $0x50] sm:$0xff]  ;;  %v809_v6 = vld [vmem:[%s1681_s6 + $0x58] sm:$0xff] }
 0x102   :  { %v1290_v30 = vpop.eup %1289  ;;  %v407_v31 = vmul.f32 %v1288_v27, %v1121_v53  ;;  %495 = vmax.xlane.f32.xlu0 %v494_v29  ;;  %v1333_v53 = vmov 5   ;;  %v1230_v10 = vpack.c.bf16 %v809_v6, %v808_v5 }
 0x103   :  { %v404_v32 = vmul.f32 %v1290_v30, %v193_v55  ;;  %1263 = vset.pattern.permute.xlu0 %v1333_v53  ;;  %1264 = vset.pattern.permute.xlu1 %v1333_v53 }
 0x104   :  { %v1504_v33 = vmul.f32 %v1132_v57, %v407_v31  ;;  %1209 = vmatprep.subr.bf16.mxu1 %v1208_v8  ;;  %v798_v31 = vld [vmem:[%s1681_s6] sm:$0xff] }
 0x105   :  { %v1506_v34 = vmul.f32 %v404_v32, %v357_v58  ;;  %v799_v32 = vld [vmem:[%s1681_s6 + $0x8] sm:$0xff]  ;;  %v826_v8 = vld [vmem:[%s1681_s6 + $0xe0] sm:$0xff] }
 0x187   :  { %v519_v35 = vpop.xlane.xlu0 %518 }
 0x188   :  { %v523_v36 = vsub.f32 %v484_v13, %v519_v35  ;;  %v816_v35 = vld [vmem:[%s1681_s6 + $0x90] sm:$0xff] }
 0x18a   :  { %v525_v37 = vmul.f32 1.442695, %v523_v36  ;;  %v817_v36 = vld [vmem:[%s1681_s6 + $0x98] sm:$0xff] }
 0x18b   :  { %v522_v38 = vpop.xlane.xlu0 %521 }
 0x18c   :  { %1291 = vpow2.f32 %v525_v37  ;;  %v524_v39 = vsub.f32 %v1143_v12, %v522_v38  ;;  %v1210_v38 = vpack.c.bf16 %v799_v32, %v798_v31  ;;  %v585_v31 = vlaneseq }
 0x18e   :  { %v527_v40 = vmul.f32 1.442695, %v524_v39  ;;  %v586_v32 = vshrl.u32 %v585_v31, 7 }
 0x18f   :  { %v496_v44 = vpop.xlane.xlu0 %495 }
 0x190   :  { %1293 = vpow2.f32 %v527_v40  ;;  %v500_v45 = vsub.f32 %v484_v13, %v496_v44  ;;  %v1212_v40 = vpack.c.bf16 %v817_v36, %v816_v35  ;;  %v819_v44 = vld [vmem:[%s1681_s6 + $0xa8] sm:$0xff]  ;;  %v587_v35 = vsub.s32 0, %v586_v32  ;;  %v573_v36 = vld [vmem:[%s1679_s4] sm:$0x7]  ;;  %s1335_s4 = smov [#allocation2]  }
 0x192   :  { %v502_v46 = vmul.f32 1.442695, %v500_v45  ;;  %v832_v45 = vld [vmem:[%s1681_s6 + $0x110] sm:$0xff] }
 0x194   :  { %1295 = vpow2.f32 %v502_v46  ;;  %v833_v46 = vld [vmem:[%s1681_s6 + $0x118] sm:$0xff] }
 0x195   :  { %v1244_v53 = vpack.c.bf16 %v833_v46, %v832_v45 }
 0x196   :  { %v1292_v41 = vpop.eup %1291 }
 0x197   :  { %531 = vrot.lane.b32.xlu1 %v1292_v41, %s1332_s3 }
 0x19a   :  { %v1294_v42 = vpop.eup %1293 }
 0x19b   :  { %533 = vrot.lane.b32.xlu1 %v1294_v42, %s1332_s3 }
 0x19e   :  { %v1296_v51 = vpop.eup %1295 }
 0x19f   :  { %v506_v52 = vsel %vm493_vm2, %v1296_v51, 0.0 }
 0x1bf   :  { %498 = vmax.xlane.f32.xlu1 %v497_v43  ;;  %v818_v43 = vld [vmem:[%s1681_s6 + $0xa0] sm:$0xff] }
 0x209   :  { %v532_v47 = vpop.permute.xlu1 %531 }
 0x20a   :  { %v538_v48 = vsel %vm537_vm3, %v532_v47, 0.0 }
 0x20b   :  { %539 = vadd.xlane.f32.xlu0 %v538_v48 }
 0x20d   :  { %v534_v49 = vpop.permute.xlu1 %533 }
 0x20e   :  { %v541_v50 = vsel %vm537_vm3, %v534_v49, 0.0 }
 0x20f   :  { %542 = vadd.xlane.f32.xlu0 %v541_v50  ;;  %v1216_v50 = vpack.c.bf16 %v819_v44, %v818_v43 }
 0x213   :  { %507 = vadd.xlane.f32.xlu0 %v506_v52  ;;  %v803_v52 = vld [vmem:[%s1681_s6 + $0x28] sm:$0xff] }
 0x24c   :  { %v499_v54 = vpop.xlane.xlu1 %498 }
 0x24d   :  { %v501_v55 = vsub.f32 %v1143_v12, %v499_v54  ;;  %v820_v54 = vld [vmem:[%s1681_s6 + $0xb0] sm:$0xff] }
 0x24f   :  { %v504_v56 = vmul.f32 1.442695, %v501_v55 }
 0x251   :  { %1297 = vpow2.f32 %v504_v56 }
 0x25b   :  { %v1298_v57 = vpop.eup %1297 }
 0x25c   :  { %v509_v58 = vsel %vm493_vm2, %v1298_v57, 0.0 }
 0x25d   :  { %510 = vadd.xlane.f32.xlu0 %v509_v58  ;;  %v805_v58 = vld [vmem:[%s1681_s6 + $0x38] sm:$0xff] }
 0x298   :  { %v540_v61 = vpop.xlane.xlu0 %539 }
 0x299   :  { %1299 = vrcp.f32 %v540_v61 }
 0x29c   :  { %v543_v62 = vpop.xlane.xlu0 %542 }
 0x29d   :  { %1301 = vrcp.f32 %v543_v62  ;;  %v1224_v62 = vpack.c.bf16 %v823_v60, %v822_v59 }
 0x2a0   :  { %v508_v12 = vpop.xlane.xlu0 %507 }
 0x2a1   :  { %1303 = vrcp.f32 %v508_v12  ;;  %v810_v12 = vld [vmem:[%s1681_s6 + $0x60] sm:$0xff] }
 0x2a3   :  { %v1300_v63 = vpop.eup %1299 }
 0x2a4   :  { %v545_v0 = vmul.f32 %v1300_v63, %v1292_v41  ;;  %v800_v41 = vld [vmem:[%s1681_s6 + $0x10] sm:$0xff]  ;;  %v806_v63 = vld [vmem:[%s1681_s6 + $0x40] sm:$0xff] }
 0x2a6   :  { %607 = vperm.xlu0 %1263, %v545_v0  }
 0x2a7   :  { %v1302_v1 = vpop.eup %1301 }
 0x2a8   :  { %v547_v2 = vmul.f32 %v1302_v1, %v1294_v42  ;;  %v801_v42 = vld [vmem:[%s1681_s6 + $0x18] sm:$0xff]  ;;  %v824_v1 = vld [vmem:[%s1681_s6 + $0xd0] sm:$0xff] }
 0x2a9   :  { %v1214_v48 = vpack.c.bf16 %v801_v42, %v800_v41  ;;  %v595_v41 = vsub.s32 2, %v586_v32 }
 0x2aa   :  { %611 = vperm.xlu1 %1264, %v547_v2  }
 0x2ab   :  { %v1304_v14 = vpop.eup %1303  ;;  %v596_v43 = vrot.slane %v573_v36, %v595_v41 }
 0x2ac   :  { %v513_v15 = vmul.f32 %v1304_v14, %v1296_v51  ;;  %v802_v51 = vld [vmem:[%s1681_s6 + $0x20] sm:$0xff] }
 0x2ad   :  { %v1218_v55 = vpack.c.bf16 %v803_v52, %v802_v51 }
 0x2ae   :  { %1265 = vset.pattern.permute.xlu1 %v1334_v4  ;;  %v563_v18 = vsel %vm493_vm2, %v513_v15, 0.0 }
 0x2af   :  { %576 = vperm.xlu1 %1265, %v545_v0   ;;  %v807_v0 = vld [vmem:[%s1681_s6 + $0x48] sm:$0xff] }
 0x2b0   :  { %v1226_v3 = vpack.c.bf16 %v807_v0, %v806_v63 }
 0x2b3   :  { %581 = vperm.xlu1 %1265, %v547_v2   ;;  %v825_v2 = vld [vmem:[%s1681_s6 + $0xd8] sm:$0xff] }
 0x2b4   :  { %v1228_v4 = vpack.c.bf16 %v825_v2, %v824_v1 }
 0x2ea   :  { %v511_v13 = vpop.xlane.xlu0 %510 }
 0x2eb   :  { %1305 = vrcp.f32 %v511_v13  ;;  %v811_v13 = vld [vmem:[%s1681_s6 + $0x68] sm:$0xff] }
 0x2ec   :  { %v1234_v14 = vpack.c.bf16 %v811_v13, %v810_v12 }
 0x2f5   :  { %v1306_v16 = vpop.eup %1305 }
 0x2f6   :  { %v515_v17 = vmul.f32 %v1306_v16, %v1298_v57  ;;  %v804_v57 = vld [vmem:[%s1681_s6 + $0x30] sm:$0xff]  ;;  %v829_v16 = vld [vmem:[%s1681_s6 + $0xf8] sm:$0xff] }
 0x2f7   :  { %v1222_v61 = vpack.c.bf16 %v805_v58, %v804_v57 }
 0x2f8   :  { %v564_v20 = vsel %vm493_vm2, %v515_v17, 0.0 }
 0x2f9   :  { %v565_v22 = vadd.f32 %v564_v20, %v563_v18  ;;  %v835_v20 = vld [vmem:[%s1681_s6 + $0x128] sm:$0xff] }
 0x2fb   :  { %v566_v23 = vrot.slane %v565_v22, 4 }
 0x2fd   :  { %v567_v24 = vadd.f32 %v566_v23, %v565_v22  ;;  %v812_v22 = vld [vmem:[%s1681_s6 + $0x70] sm:$0xff]  ;;  %v813_v23 = vld [vmem:[%s1681_s6 + $0x78] sm:$0xff] }
 0x2ff   :  { %v568_v25 = vrot.slane %v567_v24, 2 }
 0x301   :  { %v569_v27 = vadd.f32 %v568_v25, %v567_v24  ;;  %v1238_v25 = vpack.c.bf16 %v813_v23, %v812_v22 }
 0x303   :  { %v570_v29 = vrot.slane %v569_v27, 1 }
 0x305   :  { %v571_v30 = vadd.f32 %v570_v29, %v569_v27  ;;  %v836_v27 = vld [vmem:[%s1681_s6 + $0x130] sm:$0xff]  ;;  %v837_v29 = vld [vmem:[%s1681_s6 + $0x138] sm:$0xff] }
 0x307   :  { %572 = vst.msk [vmem:[%s1683_s8] sm:$0xff] %vm493_vm2, %v571_v30  ;;  %v1252_v30 = vpack.c.bf16 %v837_v29, %v836_v27 }
 0x325   :  { %v608_v37 = vpop.permute.xlu0 %607 }
 0x326   :  { %v614_v39 = vmul.f32 %v608_v37, %v513_v15  ;;  %v828_v15 = vld [vmem:[%s1681_s6 + $0xf0] sm:$0xff]  ;;  %v591_v37 = vsub.s32 1, %v586_v32 }
 0x327   :  { %v1236_v18 = vpack.c.bf16 %v829_v16, %v828_v15 }
 0x328   :  { %1035 = vmatmul.mubr.msk.f32.vlgmr.msra.gmra.mrb[2].mxu1 %vm493_vm2, %v614_v39  ;;  %1146 = vmatprep.mubr.msk.f32.mxu0 %vm493_vm2, %v614_v39  ;;  %v588_v39 = vrot.slane %v573_v36, %v587_v35 }
 0x329   :  { %v612_v47 = vpop.permute.xlu1 %611  ;;  %704 = vmatprep.mubr.f32.mxu1 %v1331_v7  ;;  %1211 = vmatpush3.bf16.msra.mxu1 %v1210_v38  ;;  %v821_v7 = vld [vmem:[%s1681_s6 + $0xb8] sm:$0xff] }
 0x32a   :  { %v615_v49 = vmul.f32 %v612_v47, %v515_v17  ;;  %1213 = vmatprep.subr.bf16.mxu1 %v1212_v40  ;;  %v1220_v56 = vpack.c.bf16 %v821_v7, %v820_v54  ;;  %v834_v17 = vld [vmem:[%s1681_s6 + $0x120] sm:$0xff]  ;;  %v592_v40 = vrot.slane %v573_v36, %v591_v37  ;;  %s1002_s6 = sshll.u32 %s1335_s4, 4  ;;  %s1003_s6 = int_to_ptr.vmem [resolvable:$true] %s1002_s6 }
 0x32b   :  { %v1248_v24 = vpack.c.bf16 %v835_v20, %v834_v17  ;;  %s1307_s21 = scalar_lea.vmem %s1003_s6, 256  ;;  %p1312_p1 = scmp.lt.s32.totalorder %s1003_s6, %s1003_s6 }
 0x32c   :  { %1036 = vmatmul.mubr.msk.f32.gmra.mrb[4].mxu1 %vm493_vm2, %v615_v49  ;;  %1147 = vmatmul.mubr.msk.f32.vlgmr.msra.gmra.mrb[12].mxu0 %vm493_vm2, %v615_v49  ;;  %p1308_p0 = scmp.ne.s32.totalorder %s1003_s6, %s1307_s21  ;;  %p1313_p2 = scmp.lt.s32.totalorder %s1307_s21, %s1307_s21 }
 0x32d   :  { %1215 = vmatpush3.bf16.msra.mxu1 %v1214_v48  ;;  %1243 = vmatpush3.bf16.msra.mxu0 %v1240_v11  ;;  %v1232_v11 = vpack.c.bf16 %v827_v9, %v826_v8 }
 0x32e   :  { %1217 = vmatprep.subr.bf16.mxu1 %v1216_v50  ;;  %1245 = vmatprep.subr.bf16.mxu0 %v1244_v53  ;;  %v577_v38 = vpop.permute.xlu1 %576  ;;  %p1314_p3 = por %p1313_p2, %p1312_p1 }
 0x32f   :  { %v600_v42 = vmul.f32 %v588_v39, %v577_v38  ;;  %v601_v46 = vmul.f32 %v592_v40, %v577_v38 }
 0x330   :  { %p1315_p4 = pnand %p1314_p3, %p1308_p0 }
 0x331   :  { %1219 = vmatpush3.bf16.msra.mxu1 %v1218_v55  ;;  %1247 = vmatpush3.bf16.msra.mxu0 %v1244_v53 }
 0x332   :  { %1221 = vmatprep.subr.bf16.mxu1 %v1220_v56  ;;  %1249 = vmatprep.subr.bf16.mxu0 %v1248_v24  ;;  %v582_v44 = vpop.permute.xlu1 %581  ;;  %v602_v56 = vmul.f32 %v596_v43, %v577_v38 }
 0x333   :  { %v603_v50 = vmul.f32 %v588_v39, %v582_v44  ;;  %v605_v51 = vmul.f32 %v596_v43, %v582_v44  ;;  %v604_v53 = vmul.f32 %v592_v40, %v582_v44 }
 0x335   :  { %1223 = vmatpush3.bf16.msra.mxu1 %v1222_v61  ;;  %1251 = vmatpush3.bf16.msra.mxu0 %v1248_v24 }
 0x336   :  { %1225 = vmatprep.subr.bf16.mxu1 %v1224_v62  ;;  %1253 = vmatprep.subr.bf16.mxu0 %v1252_v30 }
 0x339   :  { %1227 = vmatpush3.bf16.msra.mxu1 %v1226_v3  ;;  %1255 = vmatpush3.bf16.msra.mxu0 %v1252_v30 }
 0x33a   :  { %1229 = vmatprep.subr.bf16.mxu1 %v1228_v4 }
 0x33d   :  { %1231 = vmatpush3.bf16.msra.mxu1 %v1230_v10 }
 0x33e   :  { %1233 = vmatprep.subr.bf16.mxu1 %v1232_v11 }
 0x341   :  { %1235 = vmatpush3.bf16.msra.mxu1 %v1234_v14 }
 0x342   :  { %1237 = vmatprep.subr.bf16.mxu1 %v1236_v18 }
 0x345   :  { %1239 = vmatpush3.bf16.msra.mxu1 %v1238_v25 }
 0x3fb   :  { %v700_v45 = vpop.f32.mrb[2].mxu1 }
 0x3fc   :  { %v786_v47 = vadd.f32 %v700_v45, %v600_v42  ;;  %v702_v48 = vpop.f32.mrb[3].mxu1 }
 0x3fd   :  { %v787_v49 = vadd.f32 %v702_v48, %v601_v46 }
 0x3fe   :  { %v792_v52 = vmul.f32 %v786_v47, %v1495_v19 }
 0x3ff   :  { %v793_v54 = vmul.f32 %v787_v49, %v1497_v21  ;;  %v706_v7 = vpop.f32.mrb[4].mxu1  ;;  %v1148_v55 = vpop.f32.mrb[12].mxu0 }
 0x400   :  { %v789_v57 = vadd.f32 %v706_v7, %v603_v50  ;;  %v791_v58 = vadd.f32 %v1148_v55, %v605_v51  ;;  %v708_v59 = vpop.f32.mrb[5].mxu1  ;;  %v777_v60 = vpop.f32.mrb[13].mxu0 }
 0x401   :  { %v790_v61 = vadd.f32 %v708_v59, %v604_v53  ;;  %v788_v62 = vadd.f32 %v777_v60, %v602_v56  ;;  %909 = vmatprep.mubr.f32.mxu1 %v793_v54 }
 0x402   :  { %v795_v63 = vmul.f32 %v789_v57, %v1499_v26  ;;  %v797_v0 = vmul.f32 %v791_v58, %v1504_v33  ;;  %910 = vmatmul.mubr.f32.vlgmr.msra.gmra.mrb[6].mxu1 %v792_v52 }
 0x403   :  { %v796_v19 = vmul.f32 %v790_v61, %v1501_v28  ;;  %v794_v21 = vmul.f32 %v788_v62, %v1506_v34 }
 0x405   :  { %914 = vmatprep.mubr.f32.mxu1 %v796_v19  ;;  %1165 = vmatprep.mubr.msk.f32.mxu0 %vm838_vm5, %v794_v21 }
 0x406   :  { %915 = vmatmul.mubr.f32.gmra.mrb[8].mxu1 %v795_v63  ;;  %1166 = vmatmul.mubr.msk.f32.vlgmr.msra.gmra.mrb[14].mxu0 %vm838_vm5, %v797_v0 }
 0x4d5   :  { %v1095_v1 = vpop.f32.mrb[6].mxu1 }
 0x4d6   :  { %v1096_v2 = vpop.f32.mrb[7].mxu1 }
 0x4d7   :  { %v1097_v3 = vadd.f32 %v1096_v2, %v1095_v1 }
 0x4d9   :  { %v1098_v4 = vpop.f32.mrb[8].mxu1  ;;  %v1167_v5 = vpop.f32.mrb[14].mxu0 }
 0x4da   :  { %v1099_v26 = vpop.f32.mrb[9].mxu1  ;;  %v986_v6 = vpop.f32.mrb[15].mxu0 }
 0x4db   :  { %v1100_v33 = vadd.f32 %v1099_v26, %v1098_v4  ;;  %v987_v8 = vadd.f32 %v1097_v3, %v986_v6 }
 0x4dd   :  { %v992_v9 = vadd.f32 %v1167_v5, %v1100_v33  ;;  %995 = vst.msk [vmem:[#allocation2] sm:$0xff] %vm43_vm0, %v987_v8 }
 0x4df   :  { %996 = vst.msk [vmem:[#allocation2 + $0x8] sm:$0xff] %vm43_vm0, %v992_v9 }
 0x4e0   :  { %1318 = shalt.err (!%p1315_p4)
}
 0x4e1   :  { %s1319_s24 = scalar_lea.hbm %s1682_s7, 256 }
 0x4e2   :  { %p1320_p5 = scmp.ne.s32.totalorder %s1682_s7, %s1319_s24  ;;  %p1323_p6 = scmp.lt.u32.totalorder %s1319_s24, %s1682_s7 }
 0x4e4   :  { %p1325_p7 = pnand %p1323_p6, %p1320_p5 }
 0x4e6   :  { %1328 = shalt.err (!%p1325_p7)
}
 0x4e7   :  { %s1336_s28 = smov 128   ;;  %s1337_s29 = smov 8  }
 0x4e8   :  { %1008 = dma.vmem_to_hbm [thread:$0]  %s1003_s6, 256, %s1682_s7, [#allocation3], %s1336_s28, %s1336_s28, %s1337_s29  }
 0x4e9   :  { %1329 = dma.done.wait [#allocation3], 256  }
 0x4ea   :  { %1330 = vsyncadd [#allocation3], 4294967040 }
 0x4eb   :  { %1016 = vsyncpa [#allocation3], 1 }

</bundles_post_ra>
